<compile_context>
chip_gen: v7x
topology: tpu7x:2x2x1
jax: 0.10.0
libtpu: 0.0.40
codegen_flags: <defaults>
</compile_context>

<pallas_src>
import jax
import jax.numpy as jnp
from jax.experimental import pallas as pl
from jax.experimental.pallas import tpu as pltpu


_LANE = 128
_MAX_TILE_COLS = 16384


# ----------------------------------------------------------------------------
# Kernels
# ----------------------------------------------------------------------------
def _rprelu_rowparam_kernel(x_ref, p_ref, o_ref):
    # x: (TM, TC); p: (TM, 3) with columns [bias0, alpha, bias1] — one scalar
    # per row, lane-broadcast across the spatial axis.
    p = p_ref[...]
    y = x_ref[...] + p[:, 0:1]
    o_ref[...] = jnp.where(y > 0, y, p[:, 1:2] * y) + p[:, 2:3]


def _rprelu_colparam_kernel(x_ref, p_ref, o_ref):
    # x: (TM, TC); p: (3, TC) with rows [bias0, alpha, bias1] — one value per
    # column (already expanded per element), sublane-broadcast across rows.
    p = p_ref[...]
    y = x_ref[...] + p[0:1, :]
    o_ref[...] = jnp.where(y > 0, y, p[1:2, :] * y) + p[2:3, :]


# ----------------------------------------------------------------------------
# Tiling helpers
# ----------------------------------------------------------------------------
def _sublane(dtype):
    # Sublane multiple: 8 for 4-byte dtypes, 16 for bf16, 32 for int8/fp8.
    return max(8, 32 // jnp.dtype(dtype).itemsize)


def _padded_tile_bytes(nrows, ncols, dtype):
    # Real VMEM footprint of one buffer of an (nrows, ncols) block.
    sub = _sublane(dtype)
    pr = -(-nrows // sub) * sub
    pc = -(-ncols // _LANE) * _LANE
    return pr * pc * jnp.dtype(dtype).itemsize


def _default_budgets():
    """(target_tile_bytes, vmem_limit_bytes) sized for this chip generation."""
    vmem_cap = 64 << 20  # conservative (v7x-sized) fallback
    try:
        vmem_cap = int(pltpu.get_tpu_info().vmem_capacity_bytes)
    except Exception:
        pass
    if vmem_cap >= (96 << 20):       # v5e / v6e: 128 MiB physical VMEM
        return 16 << 20, 80 << 20
    return 8 << 20, 40 << 20         # v7x: 64 MiB physical VMEM


def _choose_tiles(rows, cols, dtype, target_tile_bytes, vmem_budget_bytes,
                  params_on_rows):
    """Pick (tile_rows, tile_cols) honoring the (sublane, 128) layout rules,
    budgeting VMEM with lane-padded footprints for the double-buffered x/out
    tiles plus the stacked parameter block."""
    sub = _sublane(dtype)
    itemsize = jnp.dtype(dtype).itemsize

    # Columns: take the full width when modest (block dim == array dim is
    # always legal); otherwise a large lane-dense (multiple-of-128) tile.
    tile_cols = cols if cols <= _MAX_TILE_COLS else _MAX_TILE_COLS

    # Rows: aim for ~target_tile_bytes per x tile, using the lane-PADDED width.
    padded_row_bytes = (-(-tile_cols // _LANE) * _LANE) * itemsize
    want_rows = max(1, target_tile_bytes // padded_row_bytes)
    if rows < sub:
        tile_rows = rows             # must equal the full dim
        row_min = rows
    else:
        tile_rows = max(sub, (int(want_rows) // sub) * sub)
        tile_rows = min(tile_rows, (rows // sub) * sub)
        row_min = sub

    def footprint(tr, tc):
        xo = 2 * _padded_tile_bytes(tr, tc, dtype)           # x tile + out tile
        if params_on_rows:
            par = _padded_tile_bytes(tr, 3, dtype)            # (tr, 3) -> (tr, 128)
        else:
            par = _padded_tile_bytes(3, tc, dtype)            # (3, tc) -> (8, tc)
        return 2 * (xo + par)                                 # double-buffered

    # Shrink until the (double-buffered, padded) footprint fits the budget.
    while footprint(tile_rows, tile_cols) > vmem_budget_bytes:
        if tile_rows > row_min:
            tile_rows = max(row_min, ((tile_rows // 2) // sub) * sub)
        elif tile_cols > _LANE:
            tile_cols = max(_LANE, ((tile_cols // 2) // _LANE) * _LANE)
        else:
            break

    # Prefer >= 2 grid steps when there is enough work so v7x's second
    # TensorCore gets a share (no effect on single-TC v5e/v6e).
    if pl.cdiv(rows, tile_rows) * pl.cdiv(cols, tile_cols) == 1:
        if rows >= 2 * sub:
            tile_rows = max(sub, ((rows // 2) // sub) * sub)
        elif tile_cols >= 2 * _LANE:
            tile_cols = max(_LANE, ((tile_cols // 2) // _LANE) * _LANE)

    return int(tile_rows), int(tile_cols)


# ----------------------------------------------------------------------------
# pallas_call wrapper on a 2-D slab
# ----------------------------------------------------------------------------
def _rprelu_2d(x2d, params, params_on_rows, target_tile_bytes, vmem_limit_bytes):
    rows, cols = x2d.shape
    dt = x2d.dtype

    tile_rows, tile_cols = _choose_tiles(
        rows, cols, dt, target_tile_bytes,
        vmem_budget_bytes=int(vmem_limit_bytes * 0.9),
        params_on_rows=params_on_rows)

    # Row axis OUTER, column axis INNER: the param block (which is constant
    # along the inner axis in the row-param layout) is fetched at most once
    # per row tile (exactly once when there is a single row tile).
    grid = (pl.cdiv(rows, tile_rows), pl.cdiv(cols, tile_cols))

    if params_on_rows:
        kernel = _rprelu_rowparam_kernel
        p_spec = pl.BlockSpec((tile_rows, 3), lambda i, j: (i, 0))
    else:
        kernel = _rprelu_colparam_kernel
        p_spec = pl.BlockSpec((3, tile_cols), lambda i, j: (0, j))

    return pl.pallas_call(
        kernel,
        out_shape=jax.ShapeDtypeStruct((rows, cols), dt),
        grid=grid,
        in_specs=[
            pl.BlockSpec((tile_rows, tile_cols), lambda i, j: (i, j)),
            p_spec,
        ],
        out_specs=pl.BlockSpec((tile_rows, tile_cols), lambda i, j: (i, j)),
        compiler_params=pltpu.CompilerParams(
            dimension_semantics=("parallel", "parallel"),
            vmem_limit_bytes=vmem_limit_bytes,
        ),
    )(x2d, params)


# ----------------------------------------------------------------------------
# Public entry point (matches RPReLU.forward semantics)
# ----------------------------------------------------------------------------
def rprelu(x, bias0, alpha, bias1, *, target_tile_bytes=None,
           vmem_limit_bytes=None):
    """RPReLU forward: (x + bias0) -> per-channel PReLU(alpha) -> (+ bias1).

    Supports the module's 4D NCHW path (channel axis 1) and the 2D (B, F)
    path (feature axis 1).  bias0/alpha/bias1 are per-channel vectors.
    """
    if target_tile_bytes is None or vmem_limit_bytes is None:
        tt, vl = _default_budgets()
        target_tile_bytes = target_tile_bytes or tt
        vmem_limit_bytes = vmem_limit_bytes or vl

    dt = x.dtype
    bias0 = bias0.reshape(-1).astype(dt)
    alpha = alpha.reshape(-1).astype(dt)
    bias1 = bias1.reshape(-1).astype(dt)

    if x.ndim == 4:
        N, C, H, W = x.shape
        hw = H * W
        if hw % _LANE == 0 and hw >= 512:
            # Row-per-channel layout: (N*C, H*W), spatial axis lane-dense,
            # stacked (N*C, 3) params (row r -> channel r % C).
            x2d = x.reshape(N * C, hw)
            params = jnp.tile(jnp.stack([bias0, alpha, bias1], axis=-1), (N, 1))
            out2d = _rprelu_2d(x2d, params, True,
                               target_tile_bytes, vmem_limit_bytes)
        else:
            # Lane-dense fallback for small / unaligned spatial dims:
            # view as (N, C*H*W); params expanded per element along the lane
            # axis (still only 3*C*H*W scalars, independent of N).
            x2d = x.reshape(N, C * hw)
            params = jnp.repeat(jnp.stack([bias0, alpha, bias1], axis=0),
                                hw, axis=1)
            out2d = _rprelu_2d(x2d, params, False,
                               target_tile_bytes, vmem_limit_bytes)
        return out2d.reshape(N, C, H, W)

    if x.ndim == 2:
        params = jnp.stack([bias0, alpha, bias1], axis=0)    # (3, F)
        return _rprelu_2d(x, params, False,
                          target_tile_bytes, vmem_limit_bytes)

    # TODO(synk): the module's 3D branch is buggy upstream (it references the
    # undefined `self.bias3d`); only the 2D and 4D forward paths are implemented.
    raise ValueError("Only 2D and 4D inputs are supported.")


# Backwards-compatible name for the NCHW path.
def rprelu_nchw(x, bias0, alpha, bias1, **kw):
    return rprelu(x, bias0, alpha, bias1, **kw)


def rprelu_reference(x, bias0, alpha, bias1):
    C = x.shape[1]
    y = x + bias0.reshape(1, C, 1, 1)
    y = jnp.where(y > 0, y, alpha.reshape(1, C, 1, 1) * y)
    return y + bias1.reshape(1, C, 1, 1)


if __name__ == "__main__":
    key = jax.random.PRNGKey(0)
    kx, k0, ka, k1 = jax.random.split(key, 4)

    # Primary shape from the module spec.
    N, C, H, W = 2, 4, 16, 16
    x = jax.random.normal(kx, (N, C, H, W), dtype=jnp.float32)
    bias0 = 0.1 * jax.random.normal(k0, (C,), dtype=jnp.float32)
    alpha = 0.25 + 0.05 * jax.random.normal(ka, (C,), dtype=jnp.float32)
    bias1 = 0.1 * jax.random.normal(k1, (C,), dtype=jnp.float32)

    out = jax.block_until_ready(rprelu(x, bias0, alpha, bias1))
    ref = rprelu_reference(x, bias0, alpha, bias1)
    assert out.shape == (N, C, H, W)
    assert jnp.allclose(out, ref, atol=1e-6, rtol=1e-6)

    # Exercise both layouts: aligned/large spatial dims (row-param path) and
    # unaligned small spatial dims (lane-dense fallback path).
    for (n2, c2, h2, w2) in [(2, 4, 32, 32), (2, 3, 7, 7)]:
        kx2, k02, ka2, k12 = jax.random.split(jax.random.PRNGKey(1 + h2), 4)
        x2 = jax.random.normal(kx2, (n2, c2, h2, w2), dtype=jnp.float32)
        b02 = 0.1 * jax.random.normal(k02, (c2,), dtype=jnp.float32)
        al2 = 0.25 + 0.05 * jax.random.normal(ka2, (c2,), dtype=jnp.float32)
        b12 = 0.1 * jax.random.normal(k12, (c2,), dtype=jnp.float32)
        o2 = jax.block_until_ready(rprelu(x2, b02, al2, b12))
        r2 = rprelu_reference(x2, b02, al2, b12)
        assert jnp.allclose(o2, r2, atol=1e-6, rtol=1e-6)

    print("KERNEL_OK")
</pallas_src>

<mosaic_0001>
module attributes {stable_mosaic.version = 11 : i64} {
  func.func @_rprelu_colparam_kernel(%arg0: i32, %arg1: i32, %arg2: memref<2x512xf32, #tpu.memory_space<vmem>>, %arg3: memref<3x512xf32, #tpu.memory_space<vmem>>, %arg4: memref<2x512xf32, #tpu.memory_space<vmem>>) attributes {dimension_semantics = [#tpu.dimension_semantics<parallel>, #tpu.dimension_semantics<parallel>], iteration_bounds = array<i64: 1, 2>, scalar_prefetch = 0 : i64, scratch_operands = 0 : i64, tpu.core_type = #tpu.core_type<tc>, window_params = [{transform_indices = @transform_0, window_bounds = array<i64: 2, 512>}, {transform_indices = @transform_1, window_bounds = array<i64: 3, 512>}, {transform_indices = @transform_2, window_bounds = array<i64: 2, 512>}]} {
    %c0 = arith.constant 0 : index
    %c0_0 = arith.constant 0 : index
    %0 = vector.load %arg3[%c0, %c0_0] : memref<3x512xf32, #tpu.memory_space<vmem>>, vector<3x512xf32>
    %c0_1 = arith.constant 0 : index
    %c0_2 = arith.constant 0 : index
    %1 = vector.load %arg2[%c0_1, %c0_2] : memref<2x512xf32, #tpu.memory_space<vmem>>, vector<2x512xf32>
    %2 = vector.extract_strided_slice %0 {offsets = [0, 0], sizes = [1, 512], strides = [1, 1]} : vector<3x512xf32> to vector<1x512xf32>
    %3 = vector.broadcast %2 : vector<1x512xf32> to vector<2x512xf32>
    %4 = arith.addf %1, %3 : vector<2x512xf32>
    %cst = arith.constant 0.000000e+00 : f32
    %5 = vector.broadcast %cst : f32 to vector<2x512xf32>
    %6 = arith.cmpf ogt, %4, %5 : vector<2x512xf32>
    %7 = vector.extract_strided_slice %0 {offsets = [1, 0], sizes = [1, 512], strides = [1, 1]} : vector<3x512xf32> to vector<1x512xf32>
    %8 = vector.broadcast %7 : vector<1x512xf32> to vector<2x512xf32>
    %9 = arith.mulf %8, %4 : vector<2x512xf32>
    %10 = arith.select %6, %4, %9 : vector<2x512xi1>, vector<2x512xf32>
    %11 = vector.extract_strided_slice %0 {offsets = [2, 0], sizes = [1, 512], strides = [1, 1]} : vector<3x512xf32> to vector<1x512xf32>
    %12 = vector.broadcast %11 : vector<1x512xf32> to vector<2x512xf32>
    %13 = arith.addf %10, %12 : vector<2x512xf32>
    %c0_3 = arith.constant 0 : index
    %c0_4 = arith.constant 0 : index
    %14 = vector.load %arg4[%c0_3, %c0_4] : memref<2x512xf32, #tpu.memory_space<vmem>>, vector<2x512xf32>
    tpu.vector_store %arg4[%c0_3, %c0_4], %13 {strides = array<i32>} : memref<2x512xf32, #tpu.memory_space<vmem>>, vector<2x512xf32>,
    return
  }
  func.func @transform_0(%arg0: i32, %arg1: i32) -> (i32, i32) {
    %c0_i32 = arith.constant 0 : i32
    return %arg0, %arg1 : i32, i32
  }
  func.func @transform_1(%arg0: i32, %arg1: i32) -> (i32, i32) {
    %c0_i32 = arith.constant 0 : i32
    %c0_i32_0 = arith.constant 0 : i32
    return %c0_i32, %arg1 : i32, i32
  }
  func.func @transform_2(%arg0: i32, %arg1: i32) -> (i32, i32) {
    %c0_i32 = arith.constant 0 : i32
    return %arg0, %arg1 : i32, i32
  }
}

</mosaic_0001>

<bundles_post_ra>
// kernel: tpu_custom_call.1
= control target key start
LH: loop header
LB: loop body
LE: loop exit
PB: predicated region body
PF: predicated region fallthrough
CT: control target
= control target key end

     0   :  { %7 = vsyncpa [#allocation3], 0  ;;  %s1032_s0 = inlined_call_operand.hbm [shape: f32[2,1024], index: 0, kind: input, shape index: {}]   ;;  %s1033_s1 = inlined_call_operand.hbm [shape: f32[3,1024], index: 1, kind: input, shape index: {}]   ;;  %s1034_s2 = inlined_call_operand.hbm [shape: f32[2,1024], index: 2, kind: output, shape index: {}]  }
   0x1   :  { %9 = vsyncpa [#allocation3 + $0x1], 0 }
   0x2   :  { %10 = vsyncpa [#allocation6], 0 }
   0x3   :  { %12 = vsyncpa [#allocation6 + $0x1], 0 }
   0x4   :  { %13 = vsyncpa [#allocation4], 0 }
   0x5   :  { %15 = vsyncpa [#allocation4 + $0x1], 0  ;;  %s810_s9 = smov 0   ;;  %s812_s10 = smov 0  }
   0x6   :  { %s814_s11 = smov 0   ;;  %s816_s12 = smov 0  }
   0x7   :  { %s818_s13 = smov 0   ;;  %s820_s14 = smov 0  }
   0x8 LB: > { %s553_s15 = sadd.s32 4294967295, %s789_s14   ;;  %s554_s16 = sadd.s32 4294967294, %s789_s14   ;;  %s789_s14 = sphi %s820_s14, %s21_s14   ;;  %s785_s13 = sphi %s818_s13, %s1054_s13   ;;  %s781_s12 = sphi %s816_s12, %s1053_s12   ;;  %s777_s11 = sphi %s814_s11, %s1052_s11   ;;  %s773_s10 = sphi %s812_s10, %s1051_s10   ;;  %s769_s9 = sphi %s810_s9, %s1050_s9  }
   0x9   : > { %s30_s17 = sadd.s32 1, %s785_s13  ;;  %s42_s18 = sadd.s32 1, %s777_s11 }
   0xa   : > { %p31_p0 = scmp.ge.s32.totalorder %s30_s17, 2  ;;  %p49_p1 = scmp.ne.s32.totalorder %s777_s11, %s773_s10 }
   0xb   : > { %p50_p2 = scmp.eq.s32.totalorder %s789_s14, 0  ;;  %p55_p3 = scmp.ne.s32.totalorder %s773_s10, %s769_s9 }
   0xc   : > { %s1056_s17 = smov (%p31_p0, %s30_s17), 0  ;;  %p56_p5 = scmp.eq.s32.totalorder %s553_s15, 0 }
   0xd   : > { %p851_p4 = por %p50_p2, %p49_p1  ;;  %s38_s20 = ssub.s32 %s785_s13, %s1056_s17 }
   0xe   : > { %p107_p6 = scmp.eq.s32.totalorder %s553_s15, 1  ;;  %p40_p7 = scmp.eq.s32.totalorder %s38_s20, 0 }
   0xf   : > { %p857_p8 = por %p56_p5, %p55_p3  ;;  %p113_p10 = scmp.eq.s32.totalorder %s554_s16, 1 }
  0x10   : > { %p861_p9 = por %p107_p6, %p49_p1  ;;  %p592_p13 = scmp.lt.s32.totalorder %s789_s14, 2 }
  0x11   : > { %s1038_s21 = scalar_select %p857_p8, 1, 0 }
  0x12   : > { %s1039_s22 = scalar_select %p861_p9, 1, 0 }
  0x13   : > { %s866_s23 = scalar_select %p40_p7, %s777_s11, %s42_s18  }
  0x14   : > { %p868_p11 = por %p113_p10, %p55_p3  ;;  %s875_s25 = sand.u32 1, %s777_s11  }
  0x15   : > { %s557_s26 = sshll.u32 %s875_s25, 3  ;;  %s572_s27 = sshll.u32 %s785_s13, 7 }
  0x16   : > { %s1040_s24 = scalar_select %p868_p11, 1, 0 }
  0x17   : > { %s882_s30 = scalar_lea.hbm %s1032_s0, %s572_s27  ;;  %s137_s3 = scalar_lea.vmem [#allocation2], %s557_s26 }
  0x18   : > { %s147_s4 = sshll.u32 %s137_s3, 4  ;;  %p888_p0 = pnand %p592_p13, %p851_p4  ;;  %s884_s4 = int_to_ptr.vmem [resolvable:$true] %s147_s4 }
  0x19   : > { %s134_s6 = scalar_lea.sflag [#allocation3], %s875_s25  ;;  %s643_s7 = scalar_lea.hbm %s882_s30, 128 }
  0x1a   : > { %p644_p3 = scmp.ne.s32.totalorder %s882_s30, %s643_s7  ;;  %p645_p5 = pneg %p888_p0 }
  0x1b   : > { %s648_s16 = scalar_lea.hbm %s1032_s0, 256  ;;  %p649_p4 = scmp.lt.u32.totalorder %s882_s30, %s1032_s0 }
  0x1c   : > { %p646_p6 = pnand %p645_p5, %p644_p3  ;;  %p650_p10 = scmp.lt.u32.totalorder %s648_s16, %s643_s7 }
  0x1d   : > { %p652_p12 = scmp.lt.u32.totalorder %s643_s7, %s882_s30 }
  0x1e   : > { %p647_p7 = pneg %p646_p6  ;;  %p651_p13 = por %p650_p10, %p649_p4 }
  0x20   : > { %p653_p1 = por %p652_p12, %p651_p13 }
  0x22   : > { %p654_p2 = pnand %p653_p1, %p647_p7 }
  0x24   : > { %657 = shalt.err (!%p654_p2)
}
  0x25   : > { %s658_s20 = scalar_lea.vmem %s884_s4, 128  ;;  %s791_s26 = smov [#allocation2]  }
  0x26   : > { %p659_p3 = scmp.ne.s32.totalorder %s884_s4, %s658_s20  ;;  %s663_s27 = sshll.u32 %s791_s26, 4  ;;  %s664_s27 = int_to_ptr.vmem [resolvable:$false] %s663_s27 }
  0x27   : > { %s665_s28 = scalar_lea.vmem %s664_s27, 256  ;;  %p666_p9 = scmp.lt.s32.totalorder %s884_s4, %s664_s27 }
  0x28   : > { %p661_p6 = pnand %p659_p3, %p645_p5  ;;  %p667_p4 = scmp.lt.s32.totalorder %s665_s28, %s658_s20 }
  0x2a   : > { %p662_p11 = pneg %p661_p6  ;;  %p668_p10 = por %p667_p4, %p666_p9 }
  0x2c   : > { %p669_p12 = pnand %p668_p10, %p662_p11 }
  0x2e   : > { %672 = shalt.err (!%p669_p12)
}
  0x2f   : > { %584 = dma.hbm_to_vmem [thread:$0]  (!%p888_p0), %s882_s30, 128, %s884_s4, %s134_s6  }
  0x30   : > { %p1042_p1 = scmp.lt.s32.totalorder %s789_s14, 3  ;;  %p1043_p2 = scmp.ge.s32.totalorder %s789_s14, 1 }
  0x31   : > { %s560_s3 = sshll.u32 %s875_s25, 4  ;;  %s573_s7 = sshll.u32 %s785_s13, 8 }
  0x32   : > { %p924_p7 = pnand %p1043_p2, %p1042_p1  ;;  %s933_s16 = scalar_lea.hbm %s1033_s1, %s573_s7 }
  0x33   : > { %s158_s18 = scalar_lea.vmem [#allocation5], %s560_s3  ;;  %s155_s30 = scalar_lea.sflag [#allocation6], %s875_s25 }
  0x34   : > { %s1044_s29 = scalar_select %p924_p7, 1, 0 }
  0x35   : > { %s166_s19 = sshll.u32 %s158_s18, 4  ;;  %s673_s4 = scalar_lea.hbm %s933_s16, 256  ;;  %s167_s19 = int_to_ptr.vmem [resolvable:$true] %s166_s19 }
  0x36   : > { %p674_p9 = scmp.ne.s32.totalorder %s933_s16, %s673_s4  ;;  %s678_s26 = scalar_lea.hbm %s1033_s1, 512 }
  0x37   : > { %p679_p3 = scmp.lt.u32.totalorder %s933_s16, %s1033_s1  ;;  %p680_p6 = scmp.lt.u32.totalorder %s678_s26, %s673_s4 }
  0x38   : > { %p676_p11 = pnand %p674_p9, %p645_p5  ;;  %p682_p10 = scmp.lt.u32.totalorder %s673_s4, %s933_s16 }
  0x39   : > { %p681_p4 = por %p680_p6, %p679_p3 }
  0x3a   : > { %p677_p13 = pneg %p676_p11 }
  0x3b   : > { %p683_p12 = por %p682_p10, %p681_p4 }
  0x3d   : > { %p684_p1 = pnand %p683_p12, %p677_p13 }
  0x3f   : > { %687 = shalt.err (!%p684_p1)
}
  0x40   : > { %s688_s25 = scalar_lea.vmem %s167_s19, 256  ;;  %s792_s3 = smov [#allocation5]  }
  0x41   : > { %p689_p2 = scmp.ne.s32.totalorder %s167_s19, %s688_s25  ;;  %s693_s7 = sshll.u32 %s792_s3, 4  ;;  %s694_s7 = int_to_ptr.vmem [resolvable:$false] %s693_s7 }
  0x42   : > { %s695_s8 = scalar_lea.vmem %s694_s7, 512  ;;  %p696_p8 = scmp.lt.s32.totalorder %s167_s19, %s694_s7 }
  0x43   : > { %p691_p9 = pnand %p689_p2, %p645_p5  ;;  %p697_p7 = scmp.lt.s32.totalorder %s695_s8, %s688_s25 }
  0x45   : > { %p692_p11 = pneg %p691_p9  ;;  %p698_p3 = por %p697_p7, %p696_p8 }
  0x47   : > { %p699_p6 = pnand %p698_p3, %p692_p11 }
  0x49   : > { %702 = shalt.err (!%p699_p6)
}
  0x4a   : > { %587 = dma.hbm_to_vmem [thread:$0]  (!%p888_p0), %s933_s16, 256, %s167_s19, %s155_s30  }
  0x4b   : > { %p1045_p13 = scmp.ne.s32.totalorder %s1044_s29, 0 }
  0x4c   : > { %s958_s15 = sand.u32 (!%p1045_p13), 1, %s773_s10   ;;  %p1046_p8 = scmp.ne.s32.totalorder (!%p1045_p13), %s1038_s21, 0 }
  0x4d   : > { %175 = sbr.rel (%p1045_p13) target bundleno = 137 (0x89), region = 28  ;;  %s564_s18 = sshll.u32 (!%p1045_p13), %s958_s15, 3 }
  0x4e   : > { %s178_s4 = scalar_lea.sflag (!%p1045_p13), [#allocation3], %s958_s15  ;;  %s964_s6 = scalar_lea.vmem (!%p1045_p13), [#allocation2], %s564_s18 }
  0x54   : > { %756 = dma.done.wait (%p1046_p8), %s178_s4, 128  }
  0x55   : > { %758 = vsyncadd (%p1046_p8), %s178_s4, 4294967168  ;;  %s565_s5 = sshll.u32 %s958_s15, 4  ;;  %s187_s29 = scalar_lea.sflag [#allocation6], %s958_s15 }
  0x56   : > { %s190_s16 = scalar_lea.vmem [#allocation5], %s565_s5 }
  0x57   : > { %760 = dma.done.wait (%p1046_p8), %s187_s29, 256  }
  0x58   : > { %762 = vsyncadd (%p1046_p8), %s187_s29, 4294967040  ;;  %v224_v0 = vlaneseq  ;;  %v793_v1 = vmov 1983009808   ;;  %v219_v7 = vld [vmem:[%s190_s16] sm:$0x77]  ;;  %v221_v27 = vld [vmem:[%s964_s6] sm:$0xff] }
  0x59   : > { %v267_v2 = vunpack.c.l.s4 %v793_v1  ;;  %v220_v8 = vld [vmem:[%s190_s16 + $0x8] sm:$0x77]  ;;  %s215_s21 = scalar_lea.vmem [#allocation7], %s564_s18  ;;  %s574_s30 = sshll.u32 %s781_s12, 7 }
  0x5a   : > { %v225_v3 = vshrl.u32 %v224_v0, 7  ;;  %s446_s19 = sshll.u32 %s215_s21, 4  ;;  %s985_s27 = scalar_lea.hbm %s1034_s2, %s574_s30  ;;  %s980_s19 = int_to_ptr.vmem [resolvable:$true] %s446_s19 }
  0x5b   : > { %v268_v6 = vunpack.c.0.s8 %v267_v2  ;;  %s430_s28 = scalar_lea.sflag [#allocation4], %s958_s15  ;;  %s703_s25 = scalar_lea.vmem %s980_s19, 128 }
  0x5c   : > { %v226_v4 = vsub.s32 0, %v225_v3  ;;  %v230_v5 = vsub.s32 4, %v225_v3  ;;  %v286_v14 = vsub.s32 1, %v225_v3  ;;  %v371_v19 = vsub.s32 2, %v225_v3  ;;  %p704_p0 = scmp.ne.s32.totalorder %s980_s19, %s703_s25  ;;  %p1047_p5 = scmp.ne.s32.totalorder %s1039_s22, 0 }
  0x5d   : > { %v271_v13 = vsub.s32 %v268_v6, %v225_v3  ;;  %v375_v20 = vsub.s32 6, %v225_v3  ;;  %v290_v23 = vsub.s32 5, %v225_v3  ;;  %s794_s12 = smov [#allocation7]  }
  0x5e   : > { %v227_v9 = vrot.slane %v219_v7, %v226_v4  ;;  %v231_v10 = vrot.slane %v219_v7, %v230_v5  ;;  %v235_v11 = vrot.slane %v220_v8, %v226_v4  ;;  %v239_v12 = vrot.slane %v220_v8, %v230_v5  ;;  %p705_p7 = pnand %p704_p0, %p1047_p5  ;;  %s707_s3 = sshll.u32 %s794_s12, 4  ;;  %s708_s3 = int_to_ptr.vmem [resolvable:$false] %s707_s3 }
  0x5f   : > { %v287_v26 = vrot.slane %v219_v7, %v286_v14  ;;  %v372_v28 = vrot.slane %v219_v7, %v371_v19  ;;  %v376_v29 = vrot.slane %v219_v7, %v375_v20  ;;  %v380_v30 = vrot.slane %v220_v8, %v371_v19  ;;  %s709_s7 = scalar_lea.vmem %s708_s3, 256  ;;  %p710_p10 = scmp.lt.s32.totalorder %s980_s19, %s708_s3 }
  0x60   : > { %v247_v15 = vrot.slane %v227_v9, %v226_v4  ;;  %v251_v16 = vrot.slane %v231_v10, %v226_v4  ;;  %v255_v17 = vrot.slane %v235_v11, %v226_v4  ;;  %v259_v18 = vrot.slane %v239_v12, %v226_v4  ;;  %p706_p4 = pneg %p705_p7  ;;  %p711_p12 = scmp.lt.s32.totalorder %s709_s7, %s703_s25 }
  0x61   : > { %v384_v31 = vrot.slane %v220_v8, %v375_v20  ;;  %v291_v33 = vrot.slane %v219_v7, %v290_v23  ;;  %v295_v34 = vrot.slane %v220_v8, %v286_v14  ;;  %v299_v36 = vrot.slane %v220_v8, %v290_v23 }
  0x62   : > { %v264_v21 = vcombine.low %v247_v15, %v251_v16  ;;  %v265_v22 = vcombine.low %v255_v17, %v259_v18  ;;  %v307_v37 = vrot.slane %v287_v26, %v286_v14  ;;  %v392_v38 = vrot.slane %v372_v28, %v371_v19  ;;  %p712_p1 = por %p711_p12, %p710_p10 }
  0x63   : > { %v396_v39 = vrot.slane %v376_v29, %v371_v19  ;;  %v400_v40 = vrot.slane %v380_v30, %v371_v19  ;;  %v404_v41 = vrot.slane %v384_v31, %v371_v19  ;;  %v311_v42 = vrot.slane %v291_v33, %v286_v14 }
  0x64   : > { %v272_v24 = vrot.slane %v264_v21, %v271_v13  ;;  %v279_v25 = vrot.slane %v265_v22, %v271_v13  ;;  %v315_v43 = vrot.slane %v295_v34, %v286_v14  ;;  %v319_v46 = vrot.slane %v299_v36, %v286_v14  ;;  %p713_p2 = pnand %p712_p1, %p706_p4 }
  0x65   : > { %v409_v50 = vcombine.low %v392_v38, %v396_v39  ;;  %v410_v51 = vcombine.low %v400_v40, %v404_v41 }
  0x66   : > { %v280_v32 = vcombine.low %v272_v24, %v279_v25 }
  0x67   : > { %v417_v57 = vrot.slane %v409_v50, %v271_v13  ;;  %v424_v58 = vrot.slane %v410_v51, %v271_v13 }
  0x68   : > { %v282_v35 = vadd.f32 %v280_v32, %v221_v27 }
  0x69   : > { %v425_v62 = vcombine.low %v417_v57, %v424_v58 }
  0x6a   : > { %v321_v44 = vcombine.high %v282_v35, %v282_v35  ;;  %v328_v45 = vrot.slane %v282_v35, %v271_v13  ;;  %vm283_vm0 = vcmp.gt.f32.partialorder %v282_v35, 0.0 }
  0x6c   : > { %v335_v47 = vrot.slane %v321_v44, %v271_v13  ;;  %v336_v48 = vcombine.high %v328_v45, %v328_v45  ;;  %v342_v49 = vmul.f32 %v328_v45, %v307_v37 }
  0x6e   : > { %v337_v52 = vcombine.high %v335_v47, %v335_v47  ;;  %v343_v53 = vmul.f32 %v336_v48, %v311_v42  ;;  %v344_v54 = vmul.f32 %v335_v47, %v315_v43 }
  0x70   : > { %v345_v55 = vmul.f32 %v337_v52, %v319_v46  ;;  %v350_v56 = vcombine.low %v342_v49, %v343_v53 }
  0x72   : > { %v351_v59 = vcombine.low %v344_v54, %v345_v55  ;;  %v358_v60 = vrot.slane %v350_v56, %v271_v13 }
  0x74   : > { %v365_v61 = vrot.slane %v351_v59, %v271_v13 }
  0x76   : > { %v366_v63 = vcombine.low %v358_v60, %v365_v61 }
  0x78   : > { %v368_v0 = vsel %vm283_vm0, %v282_v35, %v366_v63 }
  0x79   : > { %v427_v1 = vadd.f32 %v425_v62, %v368_v0 }
  0x7b   : > { %428 = vst [vmem:[%s215_s21] sm:$0xff] %v427_v1 }
  0x7c   : > { %716 = shalt.err (!%p713_p2)
}
  0x7d   : > { %s717_s8 = scalar_lea.hbm %s985_s27, 128  ;;  %s721_s4 = scalar_lea.hbm %s1034_s2, 256 }
  0x7e   : > { %p718_p9 = scmp.ne.s32.totalorder %s985_s27, %s717_s8  ;;  %p722_p6 = scmp.lt.u32.totalorder %s985_s27, %s1034_s2 }
  0x7f   : > { %p723_p13 = scmp.lt.u32.totalorder %s721_s4, %s717_s8  ;;  %p725_p0 = scmp.lt.u32.totalorder %s717_s8, %s985_s27 }
  0x80   : > { %p719_p11 = pnand %p718_p9, %p1047_p5 }
  0x81   : > { %p724_p8 = por %p723_p13, %p722_p6 }
  0x82   : > { %p720_p3 = pneg %p719_p11 }
  0x83   : > { %p726_p7 = por %p725_p0, %p724_p8 }
  0x85   : > { %p727_p4 = pnand %p726_p7, %p720_p3 }
  0x87   : > { %730 = shalt.err (!%p727_p4)
}
  0x88   : > { %579 = dma.vmem_to_hbm [thread:$0]  (%p1047_p5), %s980_s19, 128, %s985_s27, %s430_s28  }
  0x89 PF: > { %s458_s29 = sand.u32 1, %s769_s9   ;;  %p1048_p10 = scmp.ne.s32.totalorder %s1040_s24, 0 }
  0x8a   : > { %p1049_p12 = scmp.ge.s32.totalorder %s789_s14, 2  ;;  %s459_s16 = scalar_lea.sflag [#allocation4], %s458_s29 }
  0x8c   : > { %p589_p1 = pnand %p1049_p12, %p1048_p10 }
  0x8e   : > { %764 = dma.done.wait (!%p589_p1), %s459_s16, 128  }
  0x8f   : > { %766 = vsyncadd (!%p589_p1), %s459_s16, 4294967168  ;;  %s21_s14 = sadd.s32 1, %s789_s14   ;;  %s1050_s9 = smov %s773_s10 }
  0x90   : > { %p18_p2 = scmp.ge.s32.totalorder %s21_s14, 4   ;;  %s1051_s10 = smov %s777_s11 }
  0x91   : > { %s1052_s11 = smov %s866_s23  ;;  %s1053_s12 = smov %s785_s13 }
  0x92   : > { %s1054_s13 = smov %s1056_s17  ;;  %20 = sbr.rel (!%p18_p2) target bundleno = 8 (0x8), region = 86 }
  0x99   :  { %464 = vsyncpa [#allocation3], 1 }
  0x9a   :  { %466 = vsyncpa [#allocation3 + $0x1], 1 }
  0x9b   :  { %467 = vsyncpa [#allocation6], 1 }
  0x9c   :  { %469 = vsyncpa [#allocation6 + $0x1], 1 }
  0x9d   :  { %470 = vsyncpa [#allocation4], 1 }
  0x9e   :  { %472 = vsyncpa [#allocation4 + $0x1], 1 }

</bundles_post_ra>
